<compile_context>
chip_gen: v5e
topology: v5e:2x2
jax: 0.10.0
libtpu: 0.0.40
codegen_flags: <defaults>
</compile_context>

<pallas_src>
import functools
from collections import Counter

import numpy as np
import jax
import jax.numpy as jnp
from jax.experimental import pallas as pl
from jax.experimental.pallas import tpu as pltpu
from scipy.optimize import linear_sum_assignment


# ----------------------------------------------------------------------------
# helpers
# ----------------------------------------------------------------------------
def _round_up(x, m):
    return ((x + m - 1) // m) * m


# explicit scoped-VMEM limit: above v5e's 16 MiB default, below v7x's 64 MiB
# physical, comfortably inside v6e's 128 MiB.
_VMEM_LIMIT_BYTES = 40 << 20
_VMEM_BUDGET_BYTES = 28 << 20   # tile-selection budget (headroom for temporaries)


def _pick_tile_n(n8, nc_pad, t_pad,
                 budget_bytes=_VMEM_BUDGET_BYTES, min_steps=2, max_tile=512):
    """Row tile (multiple of 8) that (a) keeps the double-buffered VMEM
    footprint under `budget_bytes`, (b) minimizes row padding for the real
    N, and (c) yields at least `min_steps` grid steps so both v7x
    TensorCores get work under dimension_semantics=('parallel',)."""
    def vmem_bytes(t):
        # double-buffered per-tile f32 blocks: logits, obox, output
        tiled = 2 * 4 * (t * nc_pad + t * 8 + t * t_pad)
        # grid-resident blocks, conservatively also counted double-buffered:
        # bf16 onehot [nc_pad, t_pad] + f32 tfeat [8, t_pad]
        resident = 2 * 2 * nc_pad * t_pad + 2 * 4 * 8 * t_pad
        return tiled + resident

    if n8 <= 8:
        return 8
    steps = max(min_steps, pl.cdiv(n8, max_tile))
    tile = _round_up(pl.cdiv(n8, steps), 8)
    while tile > 8 and vmem_bytes(tile) > budget_bytes:
        steps += 1
        tile = _round_up(pl.cdiv(n8, steps), 8)
    return tile


# ----------------------------------------------------------------------------
# Pallas kernel: one (tile_n, t_pad) slab of the matching cost matrix
# ----------------------------------------------------------------------------
def _cost_kernel(logits_ref, onehot_ref, obox_ref, tfeat_ref, c_ref,
                 *, cost_bbox, cost_giou):
    # logits : [tile_n, nc_pad]  f32 flattened pred_logits (padded cls = -1e30)
    # onehot : [nc_pad, t_pad]   bf16 (-cost_class) * one_hot(tgt_ids).T (resident)
    # obox   : [tile_n, 8]       f32 pred boxes as (x0, y0, x1, y1, area, 0, 0, 0)
    # tfeat  : [8, t_pad]        f32 tgt  boxes as (x0, y0, x1, y1, area, 0, 0, 0)
    logits = logits_ref[...]

    # softmax over classes; divide -> EUP approx reciprocal (VALU is the
    # bottleneck, EUP slot is idle). Padded classes: exp(-huge) == 0.
    m = jnp.max(logits, axis=-1, keepdims=True)
    e = jnp.exp(logits - m)
    inv_sum = pl.reciprocal(jnp.sum(e, axis=-1, keepdims=True), approx=True)
    prob = (e * inv_sum).astype(jnp.bfloat16)                      # [tile_n, nc]

    # -cost_class * out_prob[:, tgt_ids] == prob @ ((-cost_class) * onehot)
    # bf16 x bf16 -> f32 on the MXU (no emulated f32 passes).
    cls_term = jnp.dot(prob, onehot_ref[...],
                       preferred_element_type=jnp.float32)         # [tile_n, T]

    ob = obox_ref[...]
    ox0, oy0 = ob[:, 0:1], ob[:, 1:2]
    ox1, oy1 = ob[:, 2:3], ob[:, 3:4]
    oarea = ob[:, 4:5]

    tf = tfeat_ref[...]
    tx0, ty0 = tf[0:1, :], tf[1:2, :]
    tx1, ty1 = tf[2:3, :], tf[3:4, :]
    tarea = tf[4:5, :]

    # intersection / enclosing-box corners (shared with the L1 cost below)
    ix0 = jnp.maximum(ox0, tx0)
    ex0 = jnp.minimum(ox0, tx0)
    iy0 = jnp.maximum(oy0, ty0)
    ey0 = jnp.minimum(oy0, ty0)
    ix1 = jnp.minimum(ox1, tx1)
    ex1 = jnp.maximum(ox1, tx1)
    iy1 = jnp.minimum(oy1, ty1)
    ey1 = jnp.maximum(oy1, ty1)

    # cost_bbox = cdist(xyxy, xyxy, p=1): |a-b| = max(a,b) - min(a,b),
    # reusing the GIoU corner intermediates (no abs / extra subtracts).
    bbox_cost = (ix0 - ex0) + (iy0 - ey0) + (ex1 - ix1) + (ey1 - iy1)

    inter = jnp.maximum(ix1 - ix0, 0.0) * jnp.maximum(iy1 - iy0, 0.0)
    union = oarea + tarea - inter
    enc = jnp.maximum(ex1 - ex0, 0.0) * jnp.maximum(ey1 - ey0, 0.0)

    # generalized IoU with the two divides fused into one and -cost_giou
    # folded into the numerator; the divide itself is an EUP approx recip:
    #   -cost_giou * giou = -cost_giou * (inter*enc - (enc-union)*union)
    #                        / (union*enc)
    num = (inter * enc - (enc - union) * union) * (-cost_giou)
    giou_term = num * pl.reciprocal(union * enc, approx=True)      # [tile_n, T]

    c_ref[...] = cost_bbox * bbox_cost + cls_term + giou_term


# ----------------------------------------------------------------------------
# wrapper: padding / layout plumbing + pallas_call
# ----------------------------------------------------------------------------
@functools.partial(jax.jit, static_argnums=(4, 5, 6))
def _cost_matrix_impl(pred_logits, pred_boxes, tgt_ids, tgt_bbox,
                      cost_class, cost_bbox, cost_giou):
    f32 = jnp.float32
    bs, nq, nc = pred_logits.shape
    N = bs * nq
    T = tgt_bbox.shape[0]

    # padded/bucketed sizes: lane-dense [*, T] stores, MXU-friendly class axis
    nc_pad = _round_up(max(nc, 1), 128)
    t_pad = _round_up(max(T, 1), 128)
    n8 = _round_up(N, 8)
    tile_n = _pick_tile_n(n8, nc_pad, t_pad)
    grid_n = pl.cdiv(n8, tile_n)
    n_pad = grid_n * tile_n

    # pred logits: pad classes with -1e30 (softmax ignores), pad rows likewise
    logits = pred_logits.reshape(N, nc).astype(f32)
    logits_p = jnp.full((n_pad, nc_pad), -1e30, f32).at[:N, :nc].set(logits)

    # (-cost_class) * one_hot(tgt_ids).T in bf16 (exact: values are 0 or
    # -cost_class), zero-padded columns/rows
    onehot = jax.nn.one_hot(tgt_ids, nc_pad, dtype=f32) * (-float(cost_class))
    onehot_t = (jnp.zeros((nc_pad, t_pad), f32).at[:, :T].set(onehot.T)
                .astype(jnp.bfloat16))

    # pred boxes -> xyxy + area; padded rows are unit boxes (no NaN hazard)
    ob = pred_boxes.reshape(N, 4).astype(f32)
    ox0 = ob[:, 0] - 0.5 * ob[:, 2]
    oy0 = ob[:, 1] - 0.5 * ob[:, 3]
    ox1 = ob[:, 0] + 0.5 * ob[:, 2]
    oy1 = ob[:, 1] + 0.5 * ob[:, 3]
    oarea = (ox1 - ox0) * (oy1 - oy0)
    zeros_n = jnp.zeros((N,), f32)
    ofeat = jnp.stack([ox0, oy0, ox1, oy1, oarea,
                       zeros_n, zeros_n, zeros_n], axis=1)          # [N, 8]
    pad_row = jnp.array([[0., 0., 1., 1., 1., 0., 0., 0.]], f32)
    ofeat_p = jnp.concatenate(
        [ofeat, jnp.tile(pad_row, (n_pad - N, 1))], axis=0)         # [n_pad, 8]

    # target boxes -> xyxy + area, hoisted out of the kernel (computed once,
    # not once per row tile); padded columns are unit boxes
    tb = tgt_bbox.astype(f32)
    tx0 = tb[:, 0] - 0.5 * tb[:, 2]
    ty0 = tb[:, 1] - 0.5 * tb[:, 3]
    tx1 = tb[:, 0] + 0.5 * tb[:, 2]
    ty1 = tb[:, 1] + 0.5 * tb[:, 3]
    tarea = (tx1 - tx0) * (ty1 - ty0)

    def pad_col(v, fill):
        return jnp.full((t_pad,), fill, f32).at[:T].set(v)

    zeros_t = jnp.zeros((t_pad,), f32)
    tfeat = jnp.stack([pad_col(tx0, 0.0), pad_col(ty0, 0.0),
                       pad_col(tx1, 1.0), pad_col(ty1, 1.0),
                       pad_col(tarea, 1.0),
                       zeros_t, zeros_t, zeros_t], axis=0)          # [8, t_pad]

    kernel = functools.partial(_cost_kernel,
                               cost_bbox=float(cost_bbox),
                               cost_giou=float(cost_giou))

    C_pad = pl.pallas_call(
        kernel,
        out_shape=jax.ShapeDtypeStruct((n_pad, t_pad), jnp.float32),
        grid=(grid_n,),
        in_specs=[
            pl.BlockSpec((tile_n, nc_pad), lambda i: (i, 0)),   # per-tile rows
            pl.BlockSpec((nc_pad, t_pad), lambda i: (0, 0)),    # resident
            pl.BlockSpec((tile_n, 8), lambda i: (i, 0)),        # per-tile rows
            pl.BlockSpec((8, t_pad), lambda i: (0, 0)),         # resident
        ],
        out_specs=pl.BlockSpec((tile_n, t_pad), lambda i: (i, 0)),
        compiler_params=pltpu.CompilerParams(
            dimension_semantics=("parallel",),
            vmem_limit_bytes=_VMEM_LIMIT_BYTES),
    )(logits_p, onehot_t, ofeat_p, tfeat)

    return C_pad[:N, :T].reshape(bs, nq, T)


def compute_cost_matrix(pred_logits, pred_boxes, tgt_ids, tgt_bbox,
                        *, cost_class=1.0, cost_bbox=1.0, cost_giou=1.0):
    """Pallas-computed cost matrix, shape [bs, num_queries, num_targets_total]."""
    return _cost_matrix_impl(pred_logits, pred_boxes, tgt_ids, tgt_bbox,
                             float(cost_class), float(cost_bbox),
                             float(cost_giou))


# ----------------------------------------------------------------------------
# HungarianMatcher forward (default path: fine_tune=False, normalize=False,
# fl=False). Hungarian assignment runs on the host, just like the reference
# (which calls .cpu() + scipy linear_sum_assignment).
# ----------------------------------------------------------------------------
class HungarianMatcher:
    def __init__(self, cost_class=1.0, cost_bbox=1.0, cost_giou=1.0,
                 epsilon=0, alpha=100):
        assert cost_class != 0 or cost_bbox != 0 or cost_giou != 0, \
            "all costs cant be 0"
        self.cost_class = cost_class
        self.cost_bbox = cost_bbox
        self.cost_giou = cost_giou
        self.epsilon = epsilon
        self.alpha = alpha

    def __call__(self, outputs, targets, fine_tune=False, normalize=False,
                 fl=False):
        # TODO(synk): fine_tune / fl branches (torch.rand-based query reuse,
        # focal-loss class cost with external cfg) not implemented here.
        assert not fine_tune and not fl

        pred_logits = outputs["pred_logits"]
        pred_boxes = outputs["pred_boxes"]

        tgt_ids = jnp.concatenate(
            [t["labels"][: t["boxes"].shape[0]] for t in targets])
        tgt_bbox = jnp.concatenate([t["boxes"] for t in targets])

        C = compute_cost_matrix(
            pred_logits, pred_boxes, tgt_ids, tgt_bbox,
            cost_class=self.cost_class, cost_bbox=self.cost_bbox,
            cost_giou=self.cost_giou)
        C_np = np.asarray(jax.device_get(C))                       # [bs, nq, T]

        sizes = [int(t["boxes"].shape[0]) for t in targets]
        chunks = np.split(C_np, np.cumsum(sizes)[:-1], axis=-1)
        idx = []
        for i, c in enumerate(chunks):
            r, cidx = linear_sum_assignment(c[i])
            idx.append((np.asarray(r, dtype=np.int64),
                        np.asarray(cidx, dtype=np.int64)))

        Coef = []
        for i, (_, tgt) in enumerate(idx):
            if normalize:
                cur = tgt.tolist()
                num = Counter(cur)
                coef = np.asarray([1.0 / num[j] for j in cur], dtype=np.float32)
            elif "ratio" in targets[i]:
                coef = np.asarray(targets[i]["ratio"], dtype=np.float32)
            else:
                coef = np.ones(len(tgt), dtype=np.float32)
            Coef.append(coef)
        return idx, Coef


# ----------------------------------------------------------------------------
# Pure-numpy reference of the cost matrix (for a correctness check)
# ----------------------------------------------------------------------------
def _ref_cost_matrix(pred_logits, pred_boxes, tgt_ids, tgt_bbox,
                     cost_class, cost_bbox, cost_giou):
    def cxcywh_to_xyxy(b):
        cx, cy, w, h = b[..., 0], b[..., 1], b[..., 2], b[..., 3]
        return np.stack([cx - 0.5 * w, cy - 0.5 * h,
                         cx + 0.5 * w, cy + 0.5 * h], axis=-1)

    bs, nq, nc = pred_logits.shape
    logits = pred_logits.reshape(-1, nc).astype(np.float64)
    prob = np.exp(logits - logits.max(-1, keepdims=True))
    prob /= prob.sum(-1, keepdims=True)
    cls_cost = -prob[:, tgt_ids]

    ob = cxcywh_to_xyxy(pred_boxes.reshape(-1, 4).astype(np.float64))
    tb = cxcywh_to_xyxy(tgt_bbox.astype(np.float64))
    bbox_cost = np.abs(ob[:, None, :] - tb[None, :, :]).sum(-1)

    area_o = (ob[:, 2] - ob[:, 0]) * (ob[:, 3] - ob[:, 1])
    area_t = (tb[:, 2] - tb[:, 0]) * (tb[:, 3] - tb[:, 1])
    lt = np.maximum(ob[:, None, :2], tb[None, :, :2])
    rb = np.minimum(ob[:, None, 2:], tb[None, :, 2:])
    wh = np.clip(rb - lt, 0, None)
    inter = wh[..., 0] * wh[..., 1]
    union = area_o[:, None] + area_t[None, :] - inter
    iou = inter / union
    lt2 = np.minimum(ob[:, None, :2], tb[None, :, :2])
    rb2 = np.maximum(ob[:, None, 2:], tb[None, :, 2:])
    wh2 = np.clip(rb2 - lt2, 0, None)
    enc = wh2[..., 0] * wh2[..., 1]
    giou = iou - (enc - union) / enc

    C = cost_bbox * bbox_cost + cost_class * cls_cost + cost_giou * (-giou)
    return C.reshape(bs, nq, -1)


# ----------------------------------------------------------------------------
if __name__ == "__main__":
    key = jax.random.PRNGKey(0)
    bs, num_queries, num_classes = 2, 8, 32
    sizes = [3, 2]  # ground-truth boxes per image

    k1, k2, k3, k4, k5 = jax.random.split(key, 5)
    pred_logits = jax.random.normal(k1, (bs, num_queries, num_classes),
                                    dtype=jnp.float32)
    centers = jax.random.uniform(k2, (bs, num_queries, 2),
                                 minval=0.3, maxval=0.7)
    whs = jax.random.uniform(k3, (bs, num_queries, 2),
                             minval=0.1, maxval=0.3)
    pred_boxes = jnp.concatenate([centers, whs], axis=-1)           # cxcywh

    targets = []
    tkeys = jax.random.split(k4, len(sizes))
    lkeys = jax.random.split(k5, len(sizes))
    for s, tk, lk in zip(sizes, tkeys, lkeys):
        tc = jax.random.uniform(tk, (s, 2), minval=0.3, maxval=0.7)
        twh = jax.random.uniform(jax.random.fold_in(tk, 1), (s, 2),
                                 minval=0.1, maxval=0.3)
        boxes = jnp.concatenate([tc, twh], axis=-1)
        labels = jax.random.randint(lk, (s,), 0, num_classes)
        targets.append({"labels": labels, "boxes": boxes})

    matcher = HungarianMatcher(cost_class=1.0, cost_bbox=1.0, cost_giou=1.0)
    outputs = {"pred_logits": pred_logits, "pred_boxes": pred_boxes}

    # Run the Pallas cost-matrix kernel directly and block on it.
    tgt_ids = jnp.concatenate([t["labels"] for t in targets])
    tgt_bbox = jnp.concatenate([t["boxes"] for t in targets])
    C = compute_cost_matrix(pred_logits, pred_boxes, tgt_ids, tgt_bbox)
    jax.block_until_ready(C)

    # Correctness check against a numpy reference (tolerance relaxed for the
    # bf16 MXU operands and EUP approx reciprocals; the Hungarian assignment
    # is insensitive to perturbations at this scale).
    C_ref = _ref_cost_matrix(np.asarray(pred_logits), np.asarray(pred_boxes),
                             np.asarray(tgt_ids), np.asarray(tgt_bbox),
                             1.0, 1.0, 1.0)
    np.testing.assert_allclose(np.asarray(C), C_ref, rtol=1e-2, atol=1e-2)

    # Full matcher forward (Hungarian assignment on host, like the reference).
    idx, coef = matcher(outputs, targets)
    for (ri, ci), s in zip(idx, sizes):
        assert len(ri) == len(ci) == min(num_queries, s)

    print("KERNEL_OK")
</pallas_src>

<mosaic_0001>
module attributes {stable_mosaic.version = 11 : i64} {
  func.func @_cost_kernel(%arg0: i32, %arg1: memref<8x128xf32, #tpu.memory_space<vmem>>, %arg2: memref<128x128xbf16, #tpu.memory_space<vmem>>, %arg3: memref<8x8xf32, #tpu.memory_space<vmem>>, %arg4: memref<8x128xf32, #tpu.memory_space<vmem>>, %arg5: memref<8x128xf32, #tpu.memory_space<vmem>>) attributes {dimension_semantics = [#tpu.dimension_semantics<parallel>], iteration_bounds = array<i64: 2>, scalar_prefetch = 0 : i64, scratch_operands = 0 : i64, tpu.core_type = #tpu.core_type<tc>, window_params = [{transform_indices = @transform_0, window_bounds = array<i64: 8, 128>}, {pipeline_mode = #tpu.pipeline_mode<synchronous>, transform_indices = @transform_1, window_bounds = array<i64: 128, 128>}, {transform_indices = @transform_2, window_bounds = array<i64: 8, 8>}, {pipeline_mode = #tpu.pipeline_mode<synchronous>, transform_indices = @transform_3, window_bounds = array<i64: 8, 128>}, {transform_indices = @transform_4, window_bounds = array<i64: 8, 128>}]} {
    %c0 = arith.constant 0 : index
    %c0_0 = arith.constant 0 : index
    %0 = vector.load %arg1[%c0, %c0_0] : memref<8x128xf32, #tpu.memory_space<vmem>>, vector<8x128xf32>
    %cst = arith.constant dense<0xFF800000> : vector<8xf32>
    %1 = vector.multi_reduction <maximumf>, %0, %cst [1] : vector<8x128xf32> to vector<8xf32>
    %2 = vector.shape_cast %1 : vector<8xf32> to vector<8x1xf32>
    %3 = vector.broadcast %2 : vector<8x1xf32> to vector<8x128xf32>
    %4 = arith.subf %0, %3 : vector<8x128xf32>
    %5 = math.exp %4 : vector<8x128xf32>
    %cst_1 = arith.constant dense<0.000000e+00> : vector<8xf32>
    %6 = vector.multi_reduction <add>, %5, %cst_1 [1] : vector<8x128xf32> to vector<8xf32>
    %7 = vector.shape_cast %6 : vector<8xf32> to vector<8x1xf32>
    %8 = tpu.reciprocal %7 {approx = true} : vector<8x1xf32> -> vector<8x1xf32>
    %9 = vector.broadcast %8 : vector<8x1xf32> to vector<8x128xf32>
    %10 = arith.mulf %5, %9 : vector<8x128xf32>
    %11 = arith.truncf %10 : vector<8x128xf32> to vector<8x128xbf16>
    %c0_2 = arith.constant 0 : index
    %c0_3 = arith.constant 0 : index
    %12 = vector.load %arg2[%c0_2, %c0_3] : memref<128x128xbf16, #tpu.memory_space<vmem>>, vector<128x128xbf16>
    %cst_4 = arith.constant dense<0.000000e+00> : vector<8x128xf32>
    %13 = tpu.matmul %11, %12, %cst_4 {dimension_numbers = #tpu.dot_dimension_numbers<[1], [0], [0], [1], [0, 0, 1, 1], [], []>} : vector<8x128xbf16>, vector<128x128xbf16>, vector<8x128xf32> -> vector<8x128xf32>
    %c0_5 = arith.constant 0 : index
    %c0_6 = arith.constant 0 : index
    %14 = vector.load %arg3[%c0_5, %c0_6] : memref<8x8xf32, #tpu.memory_space<vmem>>, vector<8x8xf32>
    %15 = vector.extract_strided_slice %14 {offsets = [0, 0], sizes = [8, 1], strides = [1, 1]} : vector<8x8xf32> to vector<8x1xf32>
    %16 = vector.extract_strided_slice %14 {offsets = [0, 1], sizes = [8, 1], strides = [1, 1]} : vector<8x8xf32> to vector<8x1xf32>
    %17 = vector.extract_strided_slice %14 {offsets = [0, 2], sizes = [8, 1], strides = [1, 1]} : vector<8x8xf32> to vector<8x1xf32>
    %18 = vector.extract_strided_slice %14 {offsets = [0, 3], sizes = [8, 1], strides = [1, 1]} : vector<8x8xf32> to vector<8x1xf32>
    %19 = vector.extract_strided_slice %14 {offsets = [0, 4], sizes = [8, 1], strides = [1, 1]} : vector<8x8xf32> to vector<8x1xf32>
    %c0_7 = arith.constant 0 : index
    %c0_8 = arith.constant 0 : index
    %20 = vector.load %arg4[%c0_7, %c0_8] : memref<8x128xf32, #tpu.memory_space<vmem>>, vector<8x128xf32>
    %21 = vector.extract_strided_slice %20 {offsets = [0, 0], sizes = [1, 128], strides = [1, 1]} : vector<8x128xf32> to vector<1x128xf32>
    %22 = vector.extract_strided_slice %20 {offsets = [1, 0], sizes = [1, 128], strides = [1, 1]} : vector<8x128xf32> to vector<1x128xf32>
    %23 = vector.extract_strided_slice %20 {offsets = [2, 0], sizes = [1, 128], strides = [1, 1]} : vector<8x128xf32> to vector<1x128xf32>
    %24 = vector.extract_strided_slice %20 {offsets = [3, 0], sizes = [1, 128], strides = [1, 1]} : vector<8x128xf32> to vector<1x128xf32>
    %25 = vector.extract_strided_slice %20 {offsets = [4, 0], sizes = [1, 128], strides = [1, 1]} : vector<8x128xf32> to vector<1x128xf32>
    %26 = vector.broadcast %15 : vector<8x1xf32> to vector<8x128xf32>
    %27 = vector.broadcast %21 : vector<1x128xf32> to vector<8x128xf32>
    %28 = arith.maximumf %26, %27 : vector<8x128xf32>
    %29 = vector.broadcast %15 : vector<8x1xf32> to vector<8x128xf32>
    %30 = vector.broadcast %21 : vector<1x128xf32> to vector<8x128xf32>
    %31 = arith.minimumf %29, %30 : vector<8x128xf32>
    %32 = vector.broadcast %16 : vector<8x1xf32> to vector<8x128xf32>
    %33 = vector.broadcast %22 : vector<1x128xf32> to vector<8x128xf32>
    %34 = arith.maximumf %32, %33 : vector<8x128xf32>
    %35 = vector.broadcast %16 : vector<8x1xf32> to vector<8x128xf32>
    %36 = vector.broadcast %22 : vector<1x128xf32> to vector<8x128xf32>
    %37 = arith.minimumf %35, %36 : vector<8x128xf32>
    %38 = vector.broadcast %17 : vector<8x1xf32> to vector<8x128xf32>
    %39 = vector.broadcast %23 : vector<1x128xf32> to vector<8x128xf32>
    %40 = arith.minimumf %38, %39 : vector<8x128xf32>
    %41 = vector.broadcast %17 : vector<8x1xf32> to vector<8x128xf32>
    %42 = vector.broadcast %23 : vector<1x128xf32> to vector<8x128xf32>
    %43 = arith.maximumf %41, %42 : vector<8x128xf32>
    %44 = vector.broadcast %18 : vector<8x1xf32> to vector<8x128xf32>
    %45 = vector.broadcast %24 : vector<1x128xf32> to vector<8x128xf32>
    %46 = arith.minimumf %44, %45 : vector<8x128xf32>
    %47 = vector.broadcast %18 : vector<8x1xf32> to vector<8x128xf32>
    %48 = vector.broadcast %24 : vector<1x128xf32> to vector<8x128xf32>
    %49 = arith.maximumf %47, %48 : vector<8x128xf32>
    %50 = arith.subf %28, %31 : vector<8x128xf32>
    %51 = arith.subf %34, %37 : vector<8x128xf32>
    %52 = arith.addf %50, %51 : vector<8x128xf32>
    %53 = arith.subf %43, %40 : vector<8x128xf32>
    %54 = arith.addf %52, %53 : vector<8x128xf32>
    %55 = arith.subf %49, %46 : vector<8x128xf32>
    %56 = arith.addf %54, %55 : vector<8x128xf32>
    %57 = arith.subf %40, %28 : vector<8x128xf32>
    %cst_9 = arith.constant 0.000000e+00 : f32
    %58 = vector.broadcast %cst_9 : f32 to vector<8x128xf32>
    %59 = arith.maximumf %57, %58 : vector<8x128xf32>
    %60 = arith.subf %46, %34 : vector<8x128xf32>
    %cst_10 = arith.constant 0.000000e+00 : f32
    %61 = vector.broadcast %cst_10 : f32 to vector<8x128xf32>
    %62 = arith.maximumf %60, %61 : vector<8x128xf32>
    %63 = arith.mulf %59, %62 : vector<8x128xf32>
    %64 = vector.broadcast %19 : vector<8x1xf32> to vector<8x128xf32>
    %65 = vector.broadcast %25 : vector<1x128xf32> to vector<8x128xf32>
    %66 = arith.addf %64, %65 : vector<8x128xf32>
    %67 = arith.subf %66, %63 : vector<8x128xf32>
    %68 = arith.subf %43, %31 : vector<8x128xf32>
    %cst_11 = arith.constant 0.000000e+00 : f32
    %69 = vector.broadcast %cst_11 : f32 to vector<8x128xf32>
    %70 = arith.maximumf %68, %69 : vector<8x128xf32>
    %71 = arith.subf %49, %37 : vector<8x128xf32>
    %cst_12 = arith.constant 0.000000e+00 : f32
    %72 = vector.broadcast %cst_12 : f32 to vector<8x128xf32>
    %73 = arith.maximumf %71, %72 : vector<8x128xf32>
    %74 = arith.mulf %70, %73 : vector<8x128xf32>
    %75 = arith.mulf %63, %74 : vector<8x128xf32>
    %76 = arith.subf %74, %67 : vector<8x128xf32>
    %77 = arith.mulf %76, %67 : vector<8x128xf32>
    %78 = arith.subf %75, %77 : vector<8x128xf32>
    %cst_13 = arith.constant -1.000000e+00 : f32
    %79 = vector.broadcast %cst_13 : f32 to vector<8x128xf32>
    %80 = arith.mulf %78, %79 : vector<8x128xf32>
    %81 = arith.mulf %67, %74 : vector<8x128xf32>
    %82 = tpu.reciprocal %81 {approx = true} : vector<8x128xf32> -> vector<8x128xf32>
    %83 = arith.mulf %80, %82 : vector<8x128xf32>
    %cst_14 = arith.constant 1.000000e+00 : f32
    %84 = vector.broadcast %cst_14 : f32 to vector<8x128xf32>
    %85 = arith.mulf %84, %56 : vector<8x128xf32>
    %86 = arith.addf %85, %13 : vector<8x128xf32>
    %87 = arith.addf %86, %83 : vector<8x128xf32>
    %c0_15 = arith.constant 0 : index
    %c0_16 = arith.constant 0 : index
    %88 = vector.load %arg5[%c0_15, %c0_16] : memref<8x128xf32, #tpu.memory_space<vmem>>, vector<8x128xf32>
    tpu.vector_store %arg5[%c0_15, %c0_16], %87 {strides = array<i32>} : memref<8x128xf32, #tpu.memory_space<vmem>>, vector<8x128xf32>,
    return
  }
  func.func @transform_0(%arg0: i32) -> (i32, i32) {
    %c0_i32 = arith.constant 0 : i32
    %c0_i32_0 = arith.constant 0 : i32
    return %arg0, %c0_i32 : i32, i32
  }
  func.func @transform_1(%arg0: i32) -> (i32, i32) {
    %c0_i32 = arith.constant 0 : i32
    %c0_i32_0 = arith.constant 0 : i32
    %c0_i32_1 = arith.constant 0 : i32
    return %c0_i32, %c0_i32_0 : i32, i32
  }
  func.func @transform_2(%arg0: i32) -> (i32, i32) {
    %c0_i32 = arith.constant 0 : i32
    %c0_i32_0 = arith.constant 0 : i32
    return %arg0, %c0_i32 : i32, i32
  }
  func.func @transform_3(%arg0: i32) -> (i32, i32) {
    %c0_i32 = arith.constant 0 : i32
    %c0_i32_0 = arith.constant 0 : i32
    %c0_i32_1 = arith.constant 0 : i32
    return %c0_i32, %c0_i32_0 : i32, i32
  }
  func.func @transform_4(%arg0: i32) -> (i32, i32) {
    %c0_i32 = arith.constant 0 : i32
    %c0_i32_0 = arith.constant 0 : i32
    return %arg0, %c0_i32 : i32, i32
  }
}

</mosaic_0001>

<bundles_post_ra>
// kernel: _cost_matrix_impl.1
= control target key start
LH: loop header
LB: loop body
LE: loop exit
PB: predicated region body
PF: predicated region fallthrough
CT: control target
= control target key end

     0   :  { %s541_s15 = smov 0   ;;  %s593_s0 = inlined_call_operand.vmem [shape: f32[16,128], index: 0, kind: input, shape index: {}]   ;;  %s594_s1 = inlined_call_operand.vmem [shape: bf16[128,128], index: 1, kind: input, shape index: {}]   ;;  %s595_s2 = inlined_call_operand.vmem [shape: f32[16,8], index: 2, kind: input, shape index: {}]   ;;  %s596_s3 = inlined_call_operand.vmem [shape: f32[8,128], index: 3, kind: input, shape index: {}]   ;;  %s597_s4 = inlined_call_operand.vmem [shape: f32[16,128], index: 4, kind: output, shape index: {}]  }
   0x1 LB: > { %s429_s16 = sadd.s32 4294967295, %s509_s15   ;;  %p433_p0 = scmp.ge.s32.totalorder %s509_s15, 1  ;;  %s509_s15 = sphi %s541_s15, %s14_s15  }
   0x2   : > { %p170_p1 = scmp.lt.s32.totalorder %s509_s15, 3 }
   0x4   : > { %p171_p2 = pnand %p433_p0, %p170_p1 }
   0x5   : > { %p198_p3 = scmp.lt.s32.totalorder (!%p171_p2), %s429_s16, 1 }
   0x6   : > { %174 = sbr.rel (%p171_p2) target bundleno = 403 (0x193), region = 36 }
   0xb   : > { %s599_s16 = smov (!%p198_p3, %s429_s16), 1  ;;  %v478_v2 = vld [vmem:[%s594_s1 + $0x38] sm:$0xff]  ;;  %v511_v3 = vmov 0   ;;  %v512_v4 = vmov 4   ;;  %v477_v5 = vld [vmem:[%s594_s1 + $0x30] sm:$0xff]  ;;  %v476_v6 = vld [vmem:[%s594_s1 + $0x28] sm:$0xff] }
   0xc   : > { %s549_s17 = sshll.u32 %s599_s16, 3  ;;  %492 = vset.pattern.permute.xlu1 %v511_v3  ;;  %496 = vset.pattern.permute.xlu0 %v512_v4  ;;  %v513_v7 = vmov 1   ;;  %v475_v8 = vld [vmem:[%s594_s1 + $0x20] sm:$0xff]  ;;  %v474_v9 = vld [vmem:[%s594_s1 + $0x18] sm:$0xff]  ;;  %v473_v14 = vld [vmem:[%s594_s1 + $0x10] sm:$0xff]  ;;  %v514_v16 = vmov 2  }
   0xd   : > { %s201_s20 = scalar_lea.vmem %s593_s0, %s549_s17  ;;  %s205_s23 = scalar_lea.vmem %s595_s2, %s549_s17  ;;  %285 = vmatpush.bf16.msra.mxu0 %v478_v2  ;;  %v472_v15 = vld [vmem:[%s594_s1 + $0x8] sm:$0xff]  ;;  %494 = vset.pattern.permute.xlu2 %v514_v16  ;;  %v471_v17 = vld [vmem:[%s594_s1] sm:$0xff]  ;;  %v515_v18 = vmov 3  }
   0xe   : > { %v210_v0 = vld [vmem:[%s201_s20] sm:$0xff]  ;;  %s209_s20 = scalar_lea.vmem %s597_s4, %s549_s17 }
   0xf   : > { %211 = vmax.xlane.f32.xlu0 %v210_v0  ;;  %v298_v1 = vld [vmem:[%s205_s23] sm:$0xff] }
  0x10   : > { %302 = vperm.xlu1 %492, %v298_v1   ;;  %316 = vperm.xlu2 %494, %v298_v1   ;;  %v299_v25 = vld [vmem:[%s596_s3] sm:$0xff] }
  0x11   : > { %286 = vmatpush.bf16.msra.mxu0 %v477_v5  ;;  %v319_v26 = vperm.slane %v299_v25, 2  ;;  %v305_v27 = vperm.slane %v299_v25, 0  ;;  %v326_v28 = vperm.slane %v299_v25, 3  ;;  %v312_v29 = vperm.slane %v299_v25, 1 }
  0x12   : > { %v345_v42 = vperm.slane %v299_v25, 4 }
  0x15   : > { %287 = vmatpush.bf16.msra.mxu0 %v476_v6 }
  0x18   : > { %493 = vset.pattern.permute.xlu1 %v513_v7  ;;  %495 = vset.pattern.permute.xlu2 %v515_v18 }
  0x19   : > { %309 = vperm.xlu1 %493, %v298_v1   ;;  %288 = vmatpush.bf16.msra.mxu0 %v475_v8 }
  0x1a   : > { %323 = vperm.xlu2 %495, %v298_v1  }
  0x1d   : > { %289 = vmatpush.bf16.msra.mxu0 %v474_v9 }
  0x21   : > { %290 = vmatpush.bf16.msra.mxu0 %v473_v14 }
  0x25   : > { %291 = vmatpush.bf16.msra.mxu0 %v472_v15 }
  0x29   : > { %292 = vmatpush.bf16.msra.mxu0 %v471_v17 }
  0x6a   : > { %v317_v23 = vpop.permute.xlu2 %316 }
  0x6b   : > { %v320_v32 = vmin.f32 %v317_v23, %v319_v26  ;;  %v321_v38 = vmax.f32 %v317_v23, %v319_v26 }
  0x6d   : > { %v332_v60 = vsub.f32 %v321_v38, %v320_v32 }
  0x74   : > { %v324_v30 = vpop.permute.xlu2 %323 }
  0x75   : > { %v327_v34 = vmin.f32 %v324_v30, %v326_v28  ;;  %v328_v40 = vmax.f32 %v324_v30, %v326_v28 }
  0x77   : > { %v334_v63 = vsub.f32 %v328_v40, %v327_v34 }
  0x82   : > { %v212_v10 = vpop.xlane.xlu0 %211  ;;  %v303_v24 = vpop.permute.xlu1 %302 }
  0x83   : > { %v213_v11 = vsub.f32 %v210_v0, %v212_v10  ;;  %v306_v33 = vmax.f32 %v303_v24, %v305_v27  ;;  %v307_v36 = vmin.f32 %v303_v24, %v305_v27 }
  0x85   : > { %v214_v12 = vmul.f32 1.442695, %v213_v11  ;;  %v336_v39 = vsub.f32 %v320_v32, %v306_v33  ;;  %v348_v44 = vsub.f32 %v321_v38, %v307_v36  ;;  %v329_v55 = vsub.f32 %v306_v33, %v307_v36 }
  0x87   : > { %497 = vpow2.f32 %v214_v12  ;;  %v337_v43 = vmax.f32 %v336_v39, 0.0  ;;  %v349_v48 = vmax.f32 %v348_v44, 0.0 }
  0x8b   : > { %v310_v31 = vpop.permute.xlu1 %309 }
  0x8c   : > { %v313_v35 = vmax.f32 %v310_v31, %v312_v29  ;;  %v314_v37 = vmin.f32 %v310_v31, %v312_v29 }
  0x8d   : > { %v498_v13 = vpop.eup %497 }
  0x8e   : > { %216 = vadd.xlane.f32.xlu0 %v498_v13  ;;  %v338_v41 = vsub.f32 %v327_v34, %v313_v35  ;;  %v350_v46 = vsub.f32 %v328_v40, %v314_v37  ;;  %v330_v56 = vsub.f32 %v313_v35, %v314_v37 }
  0x90   : > { %v339_v45 = vmax.f32 %v338_v41, 0.0  ;;  %v351_v49 = vmax.f32 %v350_v46, 0.0  ;;  %v331_v61 = vadd.f32 %v330_v56, %v329_v55 }
  0x92   : > { %v340_v50 = vmul.f32 %v339_v45, %v337_v43  ;;  %v352_v52 = vmul.f32 %v351_v49, %v349_v48  ;;  %v333_v0 = vadd.f32 %v332_v60, %v331_v61 }
  0x94   : > { %v353_v58 = vmul.f32 %v352_v52, %v340_v50  ;;  %v335_v3 = vadd.f32 %v334_v63, %v333_v0 }
  0xa2   : > { %342 = vperm.xlu0 %496, %v298_v1  }
 0x101   : > { %v217_v19 = vpop.xlane.xlu0 %216 }
 0x102   : > { %499 = vrcp.f32 %v217_v19 }
 0x108   : > { %v500_v20 = vpop.eup %499 }
 0x109   : > { %v219_v21 = vmul.f32 %v500_v20, %v498_v13 }
 0x10b   : > { %v220_v22 = vpack.c.bf16 %v219_v21, %v219_v21 }
 0x10d   : > { %293 = vmatmul.bf16.vlgmr.msra.gmra.mxu0 %v220_v22 }
 0x114   : > { %v343_v47 = vpop.permute.xlu0 %342 }
 0x115   : > { %v346_v51 = vadd.f32 %v345_v42, %v343_v47 }
 0x117   : > { %v347_v53 = vsub.f32 %v346_v51, %v340_v50 }
 0x119   : > { %v354_v54 = vsub.f32 %v352_v52, %v347_v53  ;;  %v358_v57 = vmul.f32 %v352_v52, %v347_v53 }
 0x11b   : > { %v355_v59 = vmul.f32 %v354_v54, %v347_v53  ;;  %501 = vrcp.f32 %v358_v57 }
 0x11d   : > { %v356_v62 = vsub.f32 %v353_v58, %v355_v59 }
 0x11f   : > { %v357_v1 = vmul.f32 -1.0, %v356_v62 }
 0x121   : > { %v502_v2 = vpop.eup %501 }
 0x122   : > { %v360_v5 = vmul.f32 %v502_v2, %v357_v1 }
 0x18a   : > { %v294_v4 = vpop.f32.mrf.mxu0 }
 0x18b   : > { %v361_v6 = vadd.f32 %v335_v3, %v294_v4 }
 0x18d   : > { %v362_v7 = vadd.f32 %v361_v6, %v360_v5 }
 0x18f   : > { %363 = vst [vmem:[%s209_s20] sm:$0xff] %v362_v7 }
 0x192   : > { %v296_v8 = vpop.f32.mrf.mxu0 }
 0x193 PF: > { %s14_s15 = sadd.s32 1, %s509_s15  }
 0x194   : > { %p11_p4 = scmp.ge.s32.totalorder %s14_s15, 4  }
 0x196   :  { %13 = sbr.rel (!%p11_p4) target bundleno = 1 (0x1), region = 69 }

</bundles_post_ra>
